<compile_context>
chip_gen: v7x
topology: tpu7x:2x2x1
jax: 0.10.0
libtpu: 0.0.40
codegen_flags: <defaults>
</compile_context>

<pallas_src>
import jax
import jax.numpy as jnp
from jax.experimental import pallas as pl
from jax.experimental.pallas import tpu as pltpu

LANE = 128
SUBLANE = 8


def _round_up(n, m):
    return ((n + m - 1) // m) * m


def highway_kernel(x_ref, w_ref, b_ref, o_ref):
    """One batch tile: fused (Dp, 2*Dp) matmul, split into normal/gate halves."""
    x = x_ref[...]
    # Single MXU pass over the concatenated [Wn^T | Wg^T] weights.
    z = jnp.dot(x, w_ref[...], preferred_element_type=jnp.float32) + b_ref[...]
    dp = o_ref.shape[-1]                     # lane-aligned split point (Dp % 128 == 0)
    h = jnp.maximum(z[:, :dp], 0.0)          # relu(x Wn^T + bn)
    g = jax.nn.sigmoid(z[:, dp:])            # sigmoid(x Wg^T + bg)
    xf = x.astype(jnp.float32)
    # highway combine, folded: x + g * (h - x)
    o_ref[...] = (xf + g * (h - xf)).astype(o_ref.dtype)


def prepare_highway_params(wn, bn, wg, bg):
    """One-time preprocessing (keep out of the per-call hot path):
       - transpose PyTorch-style (D_out, D_in) weights to (D_in, D_out)
       - zero-pad the feature dim up to a multiple of 128 lanes
       - concatenate the two weights / biases along the output (lane) axis.
    Returns (w_cat (Dp, 2*Dp), b_cat (1, 2*Dp), D, Dp)."""
    D = wn.shape[0]
    Dp = max(LANE, _round_up(D, LANE))
    pad2 = ((0, Dp - D), (0, Dp - D))
    wn_t = jnp.pad(wn.T, pad2)
    wg_t = jnp.pad(wg.T, pad2)
    w_cat = jnp.concatenate([wn_t, wg_t], axis=1)            # (Dp, 2*Dp)
    bn_p = jnp.pad(bn, (0, Dp - D))
    bg_p = jnp.pad(bg, (0, Dp - D))
    b_cat = jnp.concatenate([bn_p, bg_p]).reshape(1, 2 * Dp)  # (1, 2*Dp)
    return w_cat, b_cat, D, Dp


def highway_forward(x, w_cat, b_cat, D, Dp, block_b=512):
    """x: (B, D). w_cat/b_cat from prepare_highway_params."""
    B = x.shape[0]
    block_b = min(block_b, _round_up(B, SUBLANE))
    B_pad = _round_up(B, block_b)
    x_p = jnp.pad(x, ((0, B_pad - B), (0, Dp - D)))
    grid = (B_pad // block_b,)

    # VMEM budget: resident weights/biases + double-buffered x/out tiles (+ headroom).
    itemsize = jnp.dtype(x.dtype).itemsize
    est = (w_cat.size * w_cat.dtype.itemsize
           + b_cat.size * b_cat.dtype.itemsize
           + 2 * 2 * block_b * Dp * itemsize)
    vmem_limit = min(max(int(est * 3) // 2, 32 * 1024 * 1024), 100 * 1024 * 1024)

    out = pl.pallas_call(
        highway_kernel,
        out_shape=jax.ShapeDtypeStruct((B_pad, Dp), x.dtype),
        grid_spec=pltpu.PrefetchScalarGridSpec(
            num_scalar_prefetch=0,
            grid=grid,
            in_specs=[
                pl.BlockSpec((block_b, Dp), lambda i: (i, 0)),   # x tile (pipelined)
                pl.BlockSpec((Dp, 2 * Dp), lambda i: (0, 0)),    # fused weights (resident)
                pl.BlockSpec((1, 2 * Dp), lambda i: (0, 0)),     # fused biases (resident)
            ],
            out_specs=pl.BlockSpec((block_b, Dp), lambda i: (i, 0)),
        ),
        compiler_params=pltpu.CompilerParams(
            dimension_semantics=("parallel",),   # v7x: shard batch tiles over 2 TCs
            vmem_limit_bytes=vmem_limit,
        ),
    )(x_p, w_cat, b_cat)
    return out[:B, :D]


def reference_forward(x, wn, bn, wg, bg):
    h = jnp.maximum(x @ wn.T + bn, 0.0)
    g = jax.nn.sigmoid(x @ wg.T + bg)
    return h * g + (1.0 - g) * x


if __name__ == "__main__":
    key = jax.random.PRNGKey(0)
    B, D = 8, 32          # batch=8, input_size=32
    GATE_BIAS = -1.0

    kx, kwn, kbn, kwg = jax.random.split(key, 4)

    x = jax.random.normal(kx, (B, D), dtype=jnp.float32)

    # nn.Linear-style deterministic init (uniform in [-1/sqrt(D), 1/sqrt(D)])
    bound = 1.0 / jnp.sqrt(jnp.float32(D))
    wn = jax.random.uniform(kwn, (D, D), minval=-bound, maxval=bound, dtype=jnp.float32)
    bn = jax.random.uniform(kbn, (D,), minval=-bound, maxval=bound, dtype=jnp.float32)
    wg = jax.random.uniform(kwg, (D, D), minval=-bound, maxval=bound, dtype=jnp.float32)
    bg = jnp.full((D,), GATE_BIAS, dtype=jnp.float32)   # gate_layer.bias.data.fill_(-1)

    # One-time param prep (transpose + pad + concat) — not in the per-call path.
    w_cat, b_cat, D_, Dp = prepare_highway_params(wn, bn, wg, bg)
    w_cat = jax.block_until_ready(w_cat)
    b_cat = jax.block_until_ready(b_cat)

    out = highway_forward(x, w_cat, b_cat, D_, Dp)
    jax.block_until_ready(out)

    ref = reference_forward(x, wn, bn, wg, bg)
    assert out.shape == (B, D)
    assert jnp.allclose(out, ref, atol=1e-5, rtol=1e-5), "mismatch vs reference"

    print("KERNEL_OK")
</pallas_src>

<mosaic_0001>
module attributes {stable_mosaic.version = 11 : i64} {
  func.func @highway_kernel(%arg0: i32, %arg1: memref<8x128xf32, #tpu.memory_space<vmem>>, %arg2: memref<128x256xf32, #tpu.memory_space<vmem>>, %arg3: memref<1x256xf32, #tpu.memory_space<vmem>>, %arg4: memref<8x128xf32, #tpu.memory_space<vmem>>) attributes {dimension_semantics = [#tpu.dimension_semantics<parallel>], iteration_bounds = array<i64: 1>, scalar_prefetch = 0 : i64, scratch_operands = 0 : i64, tpu.core_type = #tpu.core_type<tc>, window_params = [{transform_indices = @transform_0, window_bounds = array<i64: 8, 128>}, {pipeline_mode = #tpu.pipeline_mode<synchronous>, transform_indices = @transform_1, window_bounds = array<i64: 128, 256>}, {pipeline_mode = #tpu.pipeline_mode<synchronous>, transform_indices = @transform_2, window_bounds = array<i64: 1, 256>}, {transform_indices = @transform_3, window_bounds = array<i64: 8, 128>}]} {
    %c0 = arith.constant 0 : index
    %c0_0 = arith.constant 0 : index
    %0 = vector.load %arg1[%c0, %c0_0] : memref<8x128xf32, #tpu.memory_space<vmem>>, vector<8x128xf32>
    %c0_1 = arith.constant 0 : index
    %c0_2 = arith.constant 0 : index
    %1 = vector.load %arg2[%c0_1, %c0_2] : memref<128x256xf32, #tpu.memory_space<vmem>>, vector<128x256xf32>
    %cst = arith.constant dense<0.000000e+00> : vector<8x256xf32>
    %2 = tpu.matmul %0, %1, %cst {dimension_numbers = #tpu.dot_dimension_numbers<[1], [0], [0], [1], [0, 0, 1, 1], [], []>} : vector<8x128xf32>, vector<128x256xf32>, vector<8x256xf32> -> vector<8x256xf32>
    %c0_3 = arith.constant 0 : index
    %c0_4 = arith.constant 0 : index
    %3 = vector.load %arg3[%c0_3, %c0_4] : memref<1x256xf32, #tpu.memory_space<vmem>>, vector<1x256xf32>
    %4 = vector.broadcast %3 : vector<1x256xf32> to vector<8x256xf32>
    %5 = arith.addf %2, %4 : vector<8x256xf32>
    %6 = vector.extract_strided_slice %5 {offsets = [0, 0], sizes = [8, 128], strides = [1, 1]} : vector<8x256xf32> to vector<8x128xf32>
    %cst_5 = arith.constant 0.000000e+00 : f32
    %7 = vector.broadcast %cst_5 : f32 to vector<8x128xf32>
    %8 = arith.maximumf %6, %7 : vector<8x128xf32>
    %9 = vector.extract_strided_slice %5 {offsets = [0, 128], sizes = [8, 128], strides = [1, 1]} : vector<8x256xf32> to vector<8x128xf32>
    %10 = arith.negf %9 : vector<8x128xf32>
    %11 = math.exp %10 : vector<8x128xf32>
    %cst_6 = arith.constant 1.000000e+00 : f32
    %12 = vector.broadcast %cst_6 : f32 to vector<8x128xf32>
    %13 = arith.addf %12, %11 : vector<8x128xf32>
    %14 = arith.divf %12, %13 : vector<8x128xf32>
    %15 = arith.subf %8, %0 : vector<8x128xf32>
    %16 = arith.mulf %14, %15 : vector<8x128xf32>
    %17 = arith.addf %0, %16 : vector<8x128xf32>
    %c0_7 = arith.constant 0 : index
    %c0_8 = arith.constant 0 : index
    %18 = vector.load %arg4[%c0_7, %c0_8] : memref<8x128xf32, #tpu.memory_space<vmem>>, vector<8x128xf32>
    tpu.vector_store %arg4[%c0_7, %c0_8], %17 {strides = array<i32>} : memref<8x128xf32, #tpu.memory_space<vmem>>, vector<8x128xf32>,
    return
  }
  func.func @transform_0(%arg0: i32) -> (i32, i32) {
    %c0_i32 = arith.constant 0 : i32
    %c0_i32_0 = arith.constant 0 : i32
    return %arg0, %c0_i32 : i32, i32
  }
  func.func @transform_1(%arg0: i32) -> (i32, i32) {
    %c0_i32 = arith.constant 0 : i32
    %c0_i32_0 = arith.constant 0 : i32
    %c0_i32_1 = arith.constant 0 : i32
    return %c0_i32, %c0_i32_0 : i32, i32
  }
  func.func @transform_2(%arg0: i32) -> (i32, i32) {
    %c0_i32 = arith.constant 0 : i32
    %c0_i32_0 = arith.constant 0 : i32
    %c0_i32_1 = arith.constant 0 : i32
    return %c0_i32, %c0_i32_0 : i32, i32
  }
  func.func @transform_3(%arg0: i32) -> (i32, i32) {
    %c0_i32 = arith.constant 0 : i32
    %c0_i32_0 = arith.constant 0 : i32
    return %arg0, %c0_i32 : i32, i32
  }
}

</mosaic_0001>

<bundles_post_ra>
// kernel: tpu_custom_call.1
= control target key start
LH: loop header
LB: loop body
LE: loop exit
PB: predicated region body
PF: predicated region fallthrough
CT: control target
= control target key end

     0   :  { %8 = vsyncpa [#allocation3], 0  ;;  %s371_s0 = inlined_call_operand.hbm [shape: f32[8,128], index: 0, kind: input, shape index: {}]   ;;  %s372_s1 = inlined_call_operand.hbm [shape: f32[128,256], index: 1, kind: input, shape index: {}]   ;;  %s373_s2 = inlined_call_operand.vmem [shape: f32[1,256], index: 2, kind: input, shape index: {}]   ;;  %s374_s3 = inlined_call_operand.hbm [shape: f32[8,128], index: 3, kind: output, shape index: {}]  }
   0x1   :  { %9 = vsyncpa [#allocation6], 0 }
   0x2   :  { %10 = vsyncpa [#allocation4], 0  ;;  %s299_s12 = smov [#allocation2]   ;;  %s300_s14 = smov [#allocation5]  }
   0x3   :  { %s17_s13 = sshll.u32 %s299_s12, 4  ;;  %s26_s15 = sshll.u32 %s300_s14, 4  ;;  %s18_s13 = int_to_ptr.vmem [resolvable:$true] %s17_s13  ;;  %s325_s15 = int_to_ptr.vmem [resolvable:$true] %s26_s15 }
   0x4   :  { %s227_s18 = scalar_lea.hbm %s371_s0, 128 }
   0x5   :  { %p228_p0 = scmp.ne.s32.totalorder %s371_s0, %s227_s18  ;;  %p231_p1 = scmp.lt.u32.totalorder %s227_s18, %s371_s0 }
   0x7   :  { %p233_p2 = pnand %p231_p1, %p228_p0 }
   0x9   :  { %236 = shalt.err (!%p233_p2)
}
   0xa   :  { %s237_s23 = scalar_lea.vmem %s18_s13, 128  ;;  %p242_p4 = scmp.lt.s32.totalorder %s18_s13, %s18_s13 }
   0xb   :  { %p238_p3 = scmp.ne.s32.totalorder %s18_s13, %s237_s23  ;;  %p243_p5 = scmp.lt.s32.totalorder %s237_s23, %s237_s23 }
   0xd   :  { %p244_p6 = por %p243_p5, %p242_p4 }
   0xf   :  { %p245_p7 = pnand %p244_p6, %p238_p3 }
  0x11   :  { %248 = shalt.err (!%p245_p7)
}
  0x12   :  { %20 = dma.hbm_to_vmem [thread:$0]  %s371_s0, 128, %s18_s13, [#allocation3]  }
  0x13   :  { %s249_s28 = scalar_lea.hbm %s372_s1, 4096 }
  0x14   :  { %p250_p8 = scmp.ne.s32.totalorder %s372_s1, %s249_s28  ;;  %p253_p9 = scmp.lt.u32.totalorder %s249_s28, %s372_s1 }
  0x16   :  { %p255_p10 = pnand %p253_p9, %p250_p8 }
  0x18   :  { %258 = shalt.err (!%p255_p10)
}
  0x19   :  { %s259_s6 = scalar_lea.vmem %s325_s15, 4096  ;;  %p264_p12 = scmp.lt.s32.totalorder %s325_s15, %s325_s15 }
  0x1a   :  { %p260_p11 = scmp.ne.s32.totalorder %s325_s15, %s259_s6  ;;  %p265_p13 = scmp.lt.s32.totalorder %s259_s6, %s259_s6 }
  0x1c   :  { %p266_p0 = por %p265_p13, %p264_p12 }
  0x1e   :  { %p267_p1 = pnand %p266_p0, %p260_p11 }
  0x20   :  { %270 = shalt.err (!%p267_p1)
}
  0x21   :  { %s301_s0 = smov 256   ;;  %s302_s7 = smov 16  }
  0x22   :  { %32 = dma.hbm_to_vmem [thread:$0]  %s372_s1, 4096, %s325_s15, [#allocation6], %s301_s0, %s301_s0, %s302_s7  }
  0x23   :  { %293 = dma.done.wait [#allocation3], 128  }
  0x24   :  { %294 = vsyncadd [#allocation3], 4294967168 }
  0x25   :  { %295 = dma.done.wait [#allocation6], 4096  }
  0x26   :  { %296 = vsyncadd [#allocation6], 4294963200  ;;  %v303_v0 = vmov 0.0   ;;  %v43_v1 = vld [vmem:[#allocation5 + $0x8] sm:$0xff]  ;;  %v45_v2 = vld [vmem:[#allocation5 + $0x18] sm:$0xff]  ;;  %v76_v50 = vlaneseq  ;;  %s304_s11 = smov [#allocation7]  }
  0x27   :  { %150 = vmatprep.mubr.f32.mxu0 %v303_v0  ;;  %v42_v3 = vld [vmem:[#allocation5] sm:$0xff]  ;;  %v185_v4 = vpack.c.bf16 %v45_v2, %v43_v1  ;;  %v44_v5 = vld [vmem:[#allocation5 + $0x10] sm:$0xff]  ;;  %v47_v6 = vld [vmem:[#allocation5 + $0x28] sm:$0xff]  ;;  %s174_s12 = sshll.u32 %s304_s11, 4  ;;  %s175_s12 = int_to_ptr.vmem [resolvable:$true] %s174_s12 }
  0x28   :  { %v49_v7 = vld [vmem:[#allocation5 + $0x38] sm:$0xff]  ;;  %v187_v8 = vpack.c.bf16 %v44_v5, %v42_v3  ;;  %v46_v10 = vld [vmem:[#allocation5 + $0x20] sm:$0xff]  ;;  %v48_v11 = vld [vmem:[#allocation5 + $0x30] sm:$0xff]  ;;  %v77_v51 = vshrl.u32 %v76_v50, 7  ;;  %p276_p3 = scmp.lt.s32.totalorder %s175_s12, %s175_s12 }
  0x29   :  { %v189_v9 = vpack.c.bf16 %v49_v7, %v47_v6  ;;  %v51_v12 = vld [vmem:[#allocation5 + $0x48] sm:$0xff]  ;;  %186 = vmatprep.subr.bf16.mxu0 %v185_v4  ;;  %v53_v13 = vld [vmem:[#allocation5 + $0x58] sm:$0xff]  ;;  %v191_v14 = vpack.c.bf16 %v48_v11, %v46_v10  ;;  %v50_v16 = vld [vmem:[#allocation5 + $0x40] sm:$0xff] }
  0x2a   :  { %188 = vmatpush1.bf16.msra.mxu0 %v187_v8  ;;  %v193_v15 = vpack.c.bf16 %v53_v13, %v51_v12  ;;  %v52_v17 = vld [vmem:[#allocation5 + $0x50] sm:$0xff]  ;;  %v55_v18 = vld [vmem:[#allocation5 + $0x68] sm:$0xff]  ;;  %v57_v19 = vld [vmem:[#allocation5 + $0x78] sm:$0xff]  ;;  %v82_v52 = vsub.s32 1, %v77_v51  ;;  %v78_v59 = vsub.s32 0, %v77_v51 }
  0x2b   :  { %190 = vmatprep.subr.bf16.mxu0 %v189_v9  ;;  %v195_v20 = vpack.c.bf16 %v52_v17, %v50_v16  ;;  %v197_v21 = vpack.c.bf16 %v57_v19, %v55_v18  ;;  %v54_v22 = vld [vmem:[#allocation5 + $0x60] sm:$0xff]  ;;  %v56_v23 = vld [vmem:[#allocation5 + $0x70] sm:$0xff]  ;;  %v59_v24 = vld [vmem:[#allocation5 + $0x88] sm:$0xff] }
  0x2c   :  { %v61_v25 = vld [vmem:[#allocation5 + $0x98] sm:$0xff]  ;;  %v199_v26 = vpack.c.bf16 %v56_v23, %v54_v22  ;;  %v58_v28 = vld [vmem:[#allocation5 + $0x80] sm:$0xff]  ;;  %v60_v29 = vld [vmem:[#allocation5 + $0x90] sm:$0xff] }
  0x2d   :  { %v201_v27 = vpack.c.bf16 %v61_v25, %v59_v24  ;;  %v63_v30 = vld [vmem:[#allocation5 + $0xa8] sm:$0xff]  ;;  %v65_v31 = vld [vmem:[#allocation5 + $0xb8] sm:$0xff]  ;;  %v203_v32 = vpack.c.bf16 %v60_v29, %v58_v28  ;;  %v62_v34 = vld [vmem:[#allocation5 + $0xa0] sm:$0xff] }
  0x2e   :  { %192 = vmatpush1.bf16.msra.mxu0 %v191_v14  ;;  %v205_v33 = vpack.c.bf16 %v65_v31, %v63_v30  ;;  %v64_v35 = vld [vmem:[#allocation5 + $0xb0] sm:$0xff]  ;;  %v67_v36 = vld [vmem:[#allocation5 + $0xc8] sm:$0xff]  ;;  %v69_v37 = vld [vmem:[#allocation5 + $0xd8] sm:$0xff] }
  0x2f   :  { %194 = vmatprep.subr.bf16.mxu0 %v193_v15  ;;  %v207_v38 = vpack.c.bf16 %v64_v35, %v62_v34  ;;  %v209_v39 = vpack.c.bf16 %v69_v37, %v67_v36  ;;  %v66_v40 = vld [vmem:[#allocation5 + $0xc0] sm:$0xff]  ;;  %v68_v41 = vld [vmem:[#allocation5 + $0xd0] sm:$0xff]  ;;  %v71_v42 = vld [vmem:[#allocation5 + $0xe8] sm:$0xff] }
  0x30   :  { %v73_v43 = vld [vmem:[#allocation5 + $0xf8] sm:$0xff]  ;;  %v211_v44 = vpack.c.bf16 %v68_v41, %v66_v40  ;;  %v70_v46 = vld [vmem:[#allocation5 + $0xe0] sm:$0xff]  ;;  %v72_v47 = vld [vmem:[#allocation5 + $0xf0] sm:$0xff] }
  0x31   :  { %v213_v45 = vpack.c.bf16 %v73_v43, %v71_v42  ;;  %v215_v48 = vpack.c.bf16 %v72_v47, %v70_v46  ;;  %v41_v49 = vld [vmem:[#allocation2] sm:$0xff] }
  0x32   :  { %196 = vmatpush1.bf16.msra.mxu0 %v195_v20  ;;  %v74_v53 = vld [vmem:[%s373_s2] sm:$0x3]  ;;  %s271_s2 = scalar_lea.vmem %s175_s12, 128 }
  0x33   :  { %198 = vmatprep.subr.bf16.mxu0 %v197_v21  ;;  %v83_v54 = vrot.slane %v74_v53, %v82_v52  ;;  %v79_v61 = vrot.slane %v74_v53, %v78_v59  ;;  %p272_p2 = scmp.ne.s32.totalorder %s175_s12, %s271_s2  ;;  %p277_p4 = scmp.lt.s32.totalorder %s271_s2, %s271_s2 }
  0x35   :  { %p278_p5 = por %p277_p4, %p276_p3 }
  0x36   :  { %200 = vmatpush1.bf16.msra.mxu0 %v199_v26 }
  0x37   :  { %202 = vmatprep.subr.bf16.mxu0 %v201_v27  ;;  %p279_p6 = pnand %p278_p5, %p272_p2 }
  0x3a   :  { %204 = vmatpush1.bf16.msra.mxu0 %v203_v32 }
  0x3b   :  { %206 = vmatprep.subr.bf16.mxu0 %v205_v33 }
  0x3e   :  { %208 = vmatpush1.bf16.msra.mxu0 %v207_v38 }
  0x3f   :  { %210 = vmatprep.subr.bf16.mxu0 %v209_v39 }
  0x42   :  { %212 = vmatpush1.bf16.msra.mxu0 %v211_v44 }
  0x43   :  { %214 = vmatprep.subr.bf16.mxu0 %v213_v45 }
  0x46   :  { %216 = vmatpush1.bf16.msra.mxu0 %v215_v48 }
  0x49   :  { %151 = vmatmul.mubr.f32.vlgmr.msra.gmra.mrb[0].mxu0 %v41_v49 }
 0x11c   :  { %v152_v55 = vpop.f32.mrb[0].mxu0 }
 0x11d   :  { %v154_v56 = vpop.f32.mrb[1].mxu0  ;;  %v153_v63 = vadd.f32 %v152_v55, %v79_v61 }
 0x11e   :  { %v155_v57 = vadd.f32 %v154_v56, %v83_v54 }
 0x11f   :  { %v157_v0 = vmax.f32 %v153_v63, 0.0 }
 0x120   :  { %v184_v58 = vmul.f32 -1.442695, %v155_v57 }
 0x121   :  { %v164_v1 = vsub.f32 %v157_v0, %v41_v49 }
 0x122   :  { %223 = vpow2.f32 %v184_v58 }
 0x12c   :  { %v224_v60 = vpop.eup %223 }
 0x12d   :  { %v161_v62 = vadd.f32 1.0, %v224_v60 }
 0x12f   :  { %225 = vrcp.f32 %v161_v62 }
 0x139   :  { %v226_v2 = vpop.eup %225 }
 0x13a   :  { %v165_v3 = vmul.f32 %v226_v2, %v164_v1 }
 0x13c   :  { %v166_v4 = vadd.f32 %v165_v3, %v41_v49 }
 0x13e   :  { %167 = vst [vmem:[#allocation7] sm:$0xff] %v166_v4 }
 0x13f   :  { %282 = shalt.err (!%p279_p6)
}
 0x140   :  { %s283_s15 = scalar_lea.hbm %s374_s3, 128 }
 0x141   :  { %p284_p7 = scmp.ne.s32.totalorder %s374_s3, %s283_s15  ;;  %p287_p8 = scmp.lt.u32.totalorder %s283_s15, %s374_s3 }
 0x143   :  { %p289_p9 = pnand %p287_p8, %p284_p7 }
 0x145   :  { %292 = shalt.err (!%p289_p9)
}
 0x146   :  { %177 = dma.vmem_to_hbm [thread:$0]  %s175_s12, 128, %s374_s3, [#allocation4]  }
 0x147   :  { %297 = dma.done.wait [#allocation4], 128  }
 0x148   :  { %298 = vsyncadd [#allocation4], 4294967168 }
 0x149   :  { %181 = vsyncpa [#allocation3], 1 }
 0x14a   :  { %182 = vsyncpa [#allocation6], 1 }
 0x14b   :  { %183 = vsyncpa [#allocation4], 1 }

</bundles_post_ra>
